<compile_context>
chip_gen: v5e
topology: v5e:2x2
jax: 0.10.0
libtpu: 0.0.40
codegen_flags: <defaults>
</compile_context>

<pallas_src>
import jax
import jax.numpy as jnp
from jax.experimental import pallas as pl
from jax.experimental.pallas import tpu as pltpu

C_IN, C_HID, C_OUT = 256, 64, 1     # conv_dim=256 -> 64 -> 1 (saliency logits)
MAX_TILE_HW_BF16 = 16384            # lanes per grid step for bf16 activations
MAX_TILE_HW_F32 = 8192              # lanes per grid step for f32 activations


def saliency_head_kernel(x_ref, w1t_ref, b1_ref, w2t_ref, b2_ref, o_ref):
    # x_ref:   (256, T)   channels x pixels (NCHW-native, batch dim squeezed)
    # w1t_ref: (64, 256) bf16,  b1_ref: (64, 1) f32
    # w2t_ref: (1, 64) f32,     b2_ref: (1, 1) f32 in SMEM (scalar)
    # o_ref:   (1, T) f32       lane-dense logits
    xb = x_ref[...].astype(jnp.bfloat16)          # no-op if already bf16
    h = jnp.dot(w1t_ref[...], xb, preferred_element_type=jnp.float32)
    h = jnp.maximum(h + b1_ref[...], 0.0)         # bias + ReLU in f32 (VPU)
    y = jnp.dot(w2t_ref[...], h, preferred_element_type=jnp.float32)
    o_ref[...] = y + b2_ref[0, 0]                 # scalar bias from SMEM


def _round_up(x, m):
    return ((x + m - 1) // m) * m


def _tile_hw(hw, batch, in_itemsize):
    """Pick the largest lane tile that fits the VMEM budget, keeping >=2
    parallel grid steps when the problem allows (v7x megacore)."""
    max_tile = MAX_TILE_HW_BF16 if in_itemsize <= 2 else MAX_TILE_HW_F32
    t = max(128, min(max_tile, _round_up(hw, 128)))
    if batch * pl.cdiv(hw, t) < 2 and hw > 128:
        # Split into >=2 pixel tiles so both v7x TensorCores get work.
        t = max(128, _round_up(pl.cdiv(hw, 2), 128))
    return t


def _vmem_limit_bytes(tile, in_itemsize):
    """Explicit scoped-VMEM budget: double-buffered I/O blocks + f32 hidden
    activations + weights, with ~30% headroom."""
    in_block = C_IN * tile * in_itemsize
    cast_buf = C_IN * tile * 2 if in_itemsize > 2 else 0   # f32->bf16 copy
    h_buf = C_HID * tile * 4
    out_block = C_OUT * tile * 4
    weights = 2 * (C_HID * C_IN * 2 + C_HID * 4 + C_OUT * C_HID * 4 + 4)
    need = 2 * in_block + cast_buf + h_buf + 2 * out_block + weights
    return int(min(max(need * 1.3 + (2 << 20), 16 << 20), 48 << 20))


def saliency_head(feat_nchw, w1t, b1, w2t, b2):
    """Conv2d(256,64,1x1) -> ReLU -> Conv2d(64,1,1x1) on an NCHW feature map.

    feat_nchw may be bf16 (preferred: halves the dominant HBM read) or f32
    (cast to bf16 in-kernel before the MXU).  Output is f32 NCHW.
    """
    B, C, H, W = feat_nchw.shape
    assert C == C_IN
    HW = H * W
    x = feat_nchw.reshape(B, C_IN, HW)           # free view, stays NCHW-native
    in_itemsize = jnp.dtype(feat_nchw.dtype).itemsize

    w1t = w1t.astype(jnp.bfloat16)               # bf16 MXU operand (tiny, resident)
    b1 = b1.reshape(C_HID, 1).astype(jnp.float32)
    w2t = w2t.reshape(C_OUT, C_HID).astype(jnp.float32)
    b2 = b2.reshape(1, 1).astype(jnp.float32)

    tile = _tile_hw(HW, B, in_itemsize)
    grid = (B, pl.cdiv(HW, tile))                # partial last tile is masked

    cost = pl.CostEstimate(
        flops=2 * B * HW * (C_IN * C_HID + C_HID * C_OUT),
        transcendentals=0,
        bytes_accessed=(in_itemsize * B * HW * C_IN + 4 * B * HW * C_OUT
                        + 2 * C_IN * C_HID + 4 * (C_HID + C_OUT * C_HID + C_OUT)),
    )

    out = pl.pallas_call(
        saliency_head_kernel,
        out_shape=jax.ShapeDtypeStruct((B, C_OUT, HW), jnp.float32),
        grid_spec=pltpu.PrefetchScalarGridSpec(
            num_scalar_prefetch=0,
            grid=grid,
            in_specs=[
                pl.BlockSpec((pl.Squeezed(), C_IN, tile),
                             lambda b, t: (b, 0, t)),               # activations
                pl.BlockSpec((C_HID, C_IN), lambda b, t: (0, 0)),   # conv1 W^T bf16
                pl.BlockSpec((C_HID, 1), lambda b, t: (0, 0)),      # conv1 bias
                pl.BlockSpec((C_OUT, C_HID), lambda b, t: (0, 0)),  # conv2 W^T
                pl.BlockSpec(memory_space=pltpu.MemorySpace.SMEM),  # conv2 bias scalar
            ],
            out_specs=pl.BlockSpec((pl.Squeezed(), C_OUT, tile),
                                   lambda b, t: (b, 0, t)),
        ),
        compiler_params=pltpu.CompilerParams(
            dimension_semantics=("parallel", "parallel"),
            vmem_limit_bytes=_vmem_limit_bytes(tile, in_itemsize)),
        cost_estimate=cost,
    )(x, w1t, b1, w2t, b2)

    return out.reshape(B, C_OUT, H, W)           # already NCHW; free reshape


def image_feature_encoder_forward(high_res_featmaps, params):
    """Forward of ImageFeatureEncoder with pred_saliency=True.

    high_res_featmaps: (B, 256, H/4, W/4) output of the pixel decoder.
    Returns {'pred_saliency': (B, 1, H/4, W/4)} exactly as the module does.
    """
    w1t, b1, w2t, b2 = params
    saliency_map = saliency_head(high_res_featmaps, w1t, b1, w2t, b2)
    return {"pred_saliency": saliency_map}


def init_params(key):
    """Deterministic synthetic init for the saliency head parameters.

    PyTorch shapes: conv1.weight (64,256,1,1), conv1.bias (64,),
                    conv2.weight (1,64,1,1),   conv2.bias (1,).
    Stored as (C_out, C_in) matrices (conv weight squeezed; conv1 in bf16 for
    the MXU) and (C_out, 1) / (1, 1) f32 biases."""
    k1, k2, k3, k4 = jax.random.split(key, 4)
    w1t = (jax.random.normal(k1, (C_HID, C_IN), jnp.float32) * 0.02
           ).astype(jnp.bfloat16)
    b1 = jax.random.normal(k2, (C_HID, 1), jnp.float32) * 0.02
    w2t = jax.random.normal(k3, (C_OUT, C_HID), jnp.float32) * 0.02
    b2 = jax.random.normal(k4, (C_OUT, 1), jnp.float32) * 0.02
    return w1t, b1, w2t, b2


def reference_forward(feat_nchw, params):
    """Plain-JAX reference mirroring the kernel numerics (bf16 first matmul,
    f32 accumulation / bias / ReLU / second matmul)."""
    w1t, b1, w2t, b2 = params
    B, C, H, W = feat_nchw.shape
    x = feat_nchw.reshape(B, C, H * W).astype(jnp.bfloat16)
    h = jnp.einsum("oc,bcp->bop", w1t.astype(jnp.bfloat16), x,
                   preferred_element_type=jnp.float32)
    h = jnp.maximum(h + b1[None].astype(jnp.float32), 0.0)
    y = jnp.einsum("oc,bcp->bop", w2t.astype(jnp.float32), h,
                   preferred_element_type=jnp.float32) + b2[None]
    return y.reshape(B, C_OUT, H, W)


if __name__ == "__main__":
    key = jax.random.PRNGKey(0)
    k_feat, k_feat2, k_param = jax.random.split(key, 3)

    params = init_params(k_param)

    # bf16 pixel-decoder feature map (B, 256, H/4, W/4): the bandwidth-saving
    # path recommended by the perf review.
    B, H, W = 2, 16, 16
    high_res_featmaps = jax.random.normal(
        k_feat, (B, C_IN, H, W), jnp.float32).astype(jnp.bfloat16)

    out = image_feature_encoder_forward(high_res_featmaps, params)
    saliency = jax.block_until_ready(out["pred_saliency"])
    assert saliency.shape == (B, 1, H, W), saliency.shape
    assert saliency.dtype == jnp.float32, saliency.dtype

    ref = reference_forward(high_res_featmaps, params)
    assert jnp.allclose(saliency, ref, atol=2e-3, rtol=2e-3), (
        float(jnp.max(jnp.abs(saliency - ref))))

    # f32 input with a non-multiple-of-128 spatial size: exercises the
    # in-kernel bf16 cast, the masked partial last tile, and the >=2-step
    # tile split (megacore occupancy) -- no wrapper-side padding required.
    B2, H2, W2 = 1, 12, 14
    feat2 = jax.random.normal(k_feat2, (B2, C_IN, H2, W2), jnp.float32)
    sal2 = jax.block_until_ready(
        image_feature_encoder_forward(feat2, params)["pred_saliency"])
    ref2 = reference_forward(feat2, params)
    assert sal2.shape == (B2, 1, H2, W2), sal2.shape
    assert jnp.allclose(sal2, ref2, atol=2e-3, rtol=2e-3), (
        float(jnp.max(jnp.abs(sal2 - ref2))))

    print("KERNEL_OK")
</pallas_src>

<mosaic_0001>
module attributes {stable_mosaic.version = 11 : i64} {
  func.func @saliency_head_kernel(%arg0: i32, %arg1: i32, %arg2: memref<1x256x256xbf16, #tpu.memory_space<vmem>>, %arg3: memref<64x256xbf16, #tpu.memory_space<vmem>>, %arg4: memref<64x1xf32, #tpu.memory_space<vmem>>, %arg5: memref<1x64xf32, #tpu.memory_space<vmem>>, %arg6: memref<1x1xf32, #tpu.memory_space<smem>>, %arg7: memref<1x1x256xf32, #tpu.memory_space<vmem>>) attributes {dimension_semantics = [#tpu.dimension_semantics<parallel>, #tpu.dimension_semantics<parallel>], iteration_bounds = array<i64: 2, 1>, scalar_prefetch = 0 : i64, scratch_operands = 0 : i64, tpu.core_type = #tpu.core_type<tc>, window_params = [{transform_indices = @transform_0, window_bounds = array<i64: 1, 256, 256>}, {pipeline_mode = #tpu.pipeline_mode<synchronous>, transform_indices = @transform_1, window_bounds = array<i64: 64, 256>}, {pipeline_mode = #tpu.pipeline_mode<synchronous>, transform_indices = @transform_2, window_bounds = array<i64: 64, 1>}, {pipeline_mode = #tpu.pipeline_mode<synchronous>, transform_indices = @transform_3, window_bounds = array<i64: 1, 64>}, {transform_indices = @transform_4, window_bounds = array<i64: 1, 1>}, {transform_indices = @transform_5, window_bounds = array<i64: 1, 1, 256>}]} {
    %c0 = arith.constant 0 : index
    %c0_0 = arith.constant 0 : index
    %c0_1 = arith.constant 0 : index
    %0 = vector.load %arg2[%c0, %c0_0, %c0_1] : memref<1x256x256xbf16, #tpu.memory_space<vmem>>, vector<1x256x256xbf16>
    %1 = vector.shape_cast %0 : vector<1x256x256xbf16> to vector<256x256xbf16>
    %c0_2 = arith.constant 0 : index
    %c0_3 = arith.constant 0 : index
    %2 = vector.load %arg3[%c0_2, %c0_3] : memref<64x256xbf16, #tpu.memory_space<vmem>>, vector<64x256xbf16>
    %cst = arith.constant dense<0.000000e+00> : vector<64x256xf32>
    %3 = tpu.matmul %2, %1, %cst {dimension_numbers = #tpu.dot_dimension_numbers<[1], [0], [0], [1], [0, 0, 1, 1], [], []>} : vector<64x256xbf16>, vector<256x256xbf16>, vector<64x256xf32> -> vector<64x256xf32>
    %c0_4 = arith.constant 0 : index
    %c0_5 = arith.constant 0 : index
    %4 = vector.load %arg4[%c0_4, %c0_5] : memref<64x1xf32, #tpu.memory_space<vmem>>, vector<64x1xf32>
    %5 = vector.broadcast %4 : vector<64x1xf32> to vector<64x256xf32>
    %6 = arith.addf %3, %5 : vector<64x256xf32>
    %cst_6 = arith.constant 0.000000e+00 : f32
    %7 = vector.broadcast %cst_6 : f32 to vector<64x256xf32>
    %8 = arith.maximumf %6, %7 : vector<64x256xf32>
    %c0_7 = arith.constant 0 : index
    %c0_8 = arith.constant 0 : index
    %9 = vector.load %arg5[%c0_7, %c0_8] : memref<1x64xf32, #tpu.memory_space<vmem>>, vector<1x64xf32>
    %cst_9 = arith.constant dense<0.000000e+00> : vector<1x256xf32>
    %10 = tpu.matmul %9, %8, %cst_9 {dimension_numbers = #tpu.dot_dimension_numbers<[1], [0], [0], [1], [0, 0, 1, 1], [], []>} : vector<1x64xf32>, vector<64x256xf32>, vector<1x256xf32> -> vector<1x256xf32>
    %c0_10 = arith.constant 0 : index
    %c0_11 = arith.constant 0 : index
    %11 = memref.load %arg6[%c0_10, %c0_11] : memref<1x1xf32, #tpu.memory_space<smem>>
    %12 = vector.broadcast %11 : f32 to vector<1x256xf32>
    %13 = arith.addf %10, %12 : vector<1x256xf32>
    %c0_12 = arith.constant 0 : index
    %c0_13 = arith.constant 0 : index
    %c0_14 = arith.constant 0 : index
    %14 = vector.load %arg7[%c0_12, %c0_13, %c0_14] : memref<1x1x256xf32, #tpu.memory_space<vmem>>, vector<1x1x256xf32>
    %15 = vector.shape_cast %14 : vector<1x1x256xf32> to vector<1x256xf32>
    %16 = vector.shape_cast %13 : vector<1x256xf32> to vector<1x1x256xf32>
    tpu.vector_store %arg7[%c0_12, %c0_13, %c0_14], %16 {strides = array<i32>} : memref<1x1x256xf32, #tpu.memory_space<vmem>>, vector<1x1x256xf32>,
    return
  }
  func.func @transform_0(%arg0: i32, %arg1: i32) -> (i32, i32, i32) {
    %c0_i32 = arith.constant 0 : i32
    %c0_i32_0 = arith.constant 0 : i32
    return %arg0, %c0_i32, %arg1 : i32, i32, i32
  }
  func.func @transform_1(%arg0: i32, %arg1: i32) -> (i32, i32) {
    %c0_i32 = arith.constant 0 : i32
    %c0_i32_0 = arith.constant 0 : i32
    %c0_i32_1 = arith.constant 0 : i32
    return %c0_i32, %c0_i32_0 : i32, i32
  }
  func.func @transform_2(%arg0: i32, %arg1: i32) -> (i32, i32) {
    %c0_i32 = arith.constant 0 : i32
    %c0_i32_0 = arith.constant 0 : i32
    %c0_i32_1 = arith.constant 0 : i32
    return %c0_i32, %c0_i32_0 : i32, i32
  }
  func.func @transform_3(%arg0: i32, %arg1: i32) -> (i32, i32) {
    %c0_i32 = arith.constant 0 : i32
    %c0_i32_0 = arith.constant 0 : i32
    %c0_i32_1 = arith.constant 0 : i32
    return %c0_i32, %c0_i32_0 : i32, i32
  }
  func.func @transform_4(%arg0: i32, %arg1: i32) -> (i32, i32) {
    %c0_i32 = arith.constant 0 : i32
    %c0_i32_0 = arith.constant 0 : i32
    %c0_i32_1 = arith.constant 0 : i32
    return %c0_i32, %c0_i32_0 : i32, i32
  }
  func.func @transform_5(%arg0: i32, %arg1: i32) -> (i32, i32, i32) {
    %c0_i32 = arith.constant 0 : i32
    %c0_i32_0 = arith.constant 0 : i32
    return %arg0, %c0_i32, %arg1 : i32, i32, i32
  }
}

</mosaic_0001>

<bundles_post_ra>
// kernel: tpu_custom_call.1
= control target key start
LH: loop header
LB: loop body
LE: loop exit
PB: predicated region body
PF: predicated region fallthrough
CT: control target
= control target key end

     0   :  { %s1561_s0 = inlined_call_operand.hbm [shape: bf16[2,256,256], index: 0, kind: input, shape index: {}]   ;;  %s1562_s1 = inlined_call_operand.vmem [shape: bf16[64,256], index: 1, kind: input, shape index: {}]   ;;  %s1563_s2 = inlined_call_operand.vmem [shape: f32[64,1], index: 2, kind: input, shape index: {}]   ;;  %s1564_s3 = inlined_call_operand.vmem [shape: f32[1,64], index: 3, kind: input, shape index: {}]   ;;  %s1565_s4 = inlined_call_operand.<no memory space> [shape: f32[1,1], index: 4, kind: input, shape index: {}]   ;;  %s1566_s5 = inlined_call_operand.hbm [shape: f32[2,1,256], index: 5, kind: output, shape index: {}]  }
   0x1   :  { %10 = sst [smem:[#allocation2]] %s1565_s4 }
   0x2   :  { %11 = vsyncpa [#allocation4], 0 }
   0x3   :  { %13 = vsyncpa [#allocation4 + $0x1], 0 }
   0x4   :  { %14 = vsyncpa [#allocation5], 0 }
   0x5   :  { %16 = vsyncpa [#allocation5 + $0x1], 0  ;;  %s1280_s20 = smov 0   ;;  %s1282_s21 = smov 0  }
   0x6   :  { %s1284_s22 = smov 0   ;;  %s1286_s23 = smov 0  }
   0x7   :  { %s1288_s24 = smov 0   ;;  %s1290_s25 = smov 0  }
   0x8 LB: > { %s845_s4 = sadd.s32 4294967295, %s1242_s25   ;;  %s846_s26 = sadd.s32 4294967294, %s1242_s25   ;;  %s1242_s25 = sphi %s1290_s25, %s22_s25   ;;  %s1238_s24 = sphi %s1288_s24, %s1575_s24   ;;  %s1234_s23 = sphi %s1286_s23, %s1574_s23   ;;  %s1230_s22 = sphi %s1284_s22, %s1573_s22   ;;  %s1226_s21 = sphi %s1282_s21, %s1572_s21   ;;  %s1222_s20 = sphi %s1280_s20, %s1571_s20  }
   0x9   : > { %s34_s27 = sadd.s32 1, %s1238_s24  ;;  %s43_s28 = sadd.s32 1, %s1230_s22 }
   0xa   : > { %p36_p0 = scmp.ge.s32.totalorder %s34_s27, 2  ;;  %p50_p1 = scmp.ne.s32.totalorder %s1230_s22, %s1226_s21 }
   0xb   : > { %p51_p2 = scmp.eq.s32.totalorder %s1242_s25, 0  ;;  %p56_p3 = scmp.ne.s32.totalorder %s1226_s21, %s1222_s20 }
   0xc   : > { %s1577_s27 = smov (%p36_p0, %s34_s27), 0  ;;  %p57_p5 = scmp.eq.s32.totalorder %s845_s4, 0 }
   0xd   : > { %p1321_p4 = por %p51_p2, %p50_p1  ;;  %s38_s30 = ssub.s32 %s1238_s24, %s1577_s27 }
   0xe   : > { %p166_p6 = scmp.eq.s32.totalorder %s845_s4, 1  ;;  %p41_p7 = scmp.eq.s32.totalorder %s38_s30, 0 }
   0xf   : > { %p1327_p8 = por %p57_p5, %p56_p3  ;;  %p172_p10 = scmp.eq.s32.totalorder %s846_s26, 1 }
  0x10   : > { %p1331_p9 = por %p166_p6, %p50_p1  ;;  %p848_p12 = scmp.ge.s32.totalorder %s1242_s25, 2 }
  0x11   : > { %s1336_s8 = scalar_select %p41_p7, %s1230_s22, %s43_s28  }
  0x12   : > { %p1338_p11 = por %p172_p10, %p56_p3  ;;  %p1074_p13 = scmp.lt.s32.totalorder %s1242_s25, 2 }
  0x13   : > { %s204_s10 = sand.u32 1, %s1230_s22   ;;  %s1021_s12 = sshll.u32 %s1238_s24, 8 }
  0x14   : > { %s849_s11 = sshll.u32 %s204_s10, 8  ;;  %s215_s15 = scalar_lea.hbm %s1561_s0, %s1021_s12 }
  0x15   : > { %s208_s16 = scalar_lea.vmem [#allocation3], %s849_s11  ;;  %s216_s18 = sshll.u32 %s215_s15, 4  ;;  %s217_s18 = int_to_ptr.hbm [resolvable:$true] %s216_s18 }
  0x16   : > { %s218_s17 = sshll.u32 %s208_s16, 4  ;;  %p1067_p0 = pnand %p1074_p13, %p1321_p4  ;;  %s219_s17 = int_to_ptr.vmem [resolvable:$true] %s218_s17 }
  0x17   : > { %p852_p1 = scmp.ge.s32.totalorder %s1242_s25, 1  ;;  %s205_s19 = scalar_lea.sflag [#allocation4], %s204_s10 }
  0x18   : > { %s1244_s4 = smov 128   ;;  %s1245_s26 = smov 8  }
  0x19   : > { %1069 = dma.hbm_to_vmem [thread:$0]  (!%p1067_p0), %s217_s18, 4096, %s219_s17, %s205_s19, %s1244_s4, %s1244_s4, %s1245_s26  }
  0x1a   : > { %p226_p2 = scmp.lt.s32.totalorder %s1242_s25, 3 }
  0x1c   : > { %p227_p3 = pnand %p852_p1, %p226_p2 }
  0x1d   : > { %s1354_s28 = sand.u32 (!%p227_p3), 1, %s1226_s21  }
  0x1e   : > { %230 = sbr.rel (%p227_p3) target bundleno = 414 (0x19e), region = 40  ;;  %s853_s30 = sshll.u32 (!%p227_p3), %s1354_s28, 8 }
  0x1f   : > { %s233_s11 = scalar_lea.sflag (!%p227_p3), [#allocation4], %s1354_s28  ;;  %s1358_s12 = scalar_lea.vmem (!%p227_p3), [#allocation3], %s853_s30 }
  0x23   : > { %1213 = dma.done.wait (%p1327_p8), %s233_s11, 4096  }
  0x24   : > { %1215 = vsyncadd (%p1327_p8), %s233_s11, 4294963200  ;;  %v945_v0 = vld [vmem:[%s1358_s12 + $0x70] sm:$0xf]  ;;  %v1037_v1 = vld [vmem:[%s1358_s12 + $0x74] sm:$0xf0]  ;;  %vm689_vm0 = vcmask 523264  }
  0x25   : > { %v1036_v2 = vld [vmem:[%s1358_s12 + $0x74] sm:$0xf]  ;;  %v946_v3 = vor.u32 %v1037_v1, %v945_v0  ;;  %v947_v4 = vld [vmem:[%s1358_s12 + $0x78] sm:$0xf0]  ;;  %v1009_v9 = vld [vmem:[%s1358_s12 + $0xf0] sm:$0xf] }
  0x26   : > { %v1052_v5 = vld [vmem:[%s1358_s12 + $0xf4] sm:$0xf]  ;;  %v1011_v6 = vld [vmem:[%s1358_s12 + $0xf8] sm:$0xf0]  ;;  %v950_v7 = vor.u32 %v1036_v2, %v947_v4  ;;  %v1053_v10 = vld [vmem:[%s1358_s12 + $0xf4] sm:$0xf0] }
  0x27   : > { %v1014_v8 = vor.u32 %v1052_v5, %v1011_v6  ;;  %v937_v11 = vld [vmem:[%s1358_s12 + $0x60] sm:$0xf]  ;;  %554 = vmatpush.bf16.msra.mxu0 %v946_v3  ;;  %v1010_v12 = vor.u32 %v1053_v10, %v1009_v9  ;;  %v1035_v13 = vld [vmem:[%s1358_s12 + $0x64] sm:$0xf0]  ;;  %v1034_v14 = vld [vmem:[%s1358_s12 + $0x64] sm:$0xf] }
  0x28   : > { %v939_v15 = vld [vmem:[%s1358_s12 + $0x68] sm:$0xf0]  ;;  %612 = vmatpush.bf16.msra.mxu2 %v950_v7  ;;  %v938_v16 = vor.u32 %v1035_v13, %v937_v11  ;;  %v1050_v18 = vld [vmem:[%s1358_s12 + $0xe4] sm:$0xf]  ;;  %v1001_v20 = vld [vmem:[%s1358_s12 + $0xe0] sm:$0xf] }
  0x29   : > { %641 = vmatpush.bf16.msra.mxu3 %v1014_v8  ;;  %v942_v17 = vor.u32 %v1034_v14, %v939_v15  ;;  %v1003_v19 = vld [vmem:[%s1358_s12 + $0xe8] sm:$0xf0]  ;;  %583 = vmatpush.bf16.msra.mxu1 %v1010_v12  ;;  %v1051_v22 = vld [vmem:[%s1358_s12 + $0xe4] sm:$0xf0]  ;;  %v929_v23 = vld [vmem:[%s1358_s12 + $0x50] sm:$0xf] }
  0x2a   : > { %v1006_v21 = vor.u32 %v1050_v18, %v1003_v19  ;;  %v1033_v24 = vld [vmem:[%s1358_s12 + $0x54] sm:$0xf0]  ;;  %v1002_v25 = vor.u32 %v1051_v22, %v1001_v20  ;;  %v1032_v26 = vld [vmem:[%s1358_s12 + $0x54] sm:$0xf]  ;;  %v931_v27 = vld [vmem:[%s1358_s12 + $0x58] sm:$0xf0] }
  0x2b   : > { %v1048_v28 = vld [vmem:[%s1358_s12 + $0xd4] sm:$0xf]  ;;  %555 = vmatpush.bf16.msra.mxu0 %v938_v16  ;;  %v930_v29 = vor.u32 %v1033_v24, %v929_v23  ;;  %v995_v30 = vld [vmem:[%s1358_s12 + $0xd8] sm:$0xf0]  ;;  %v993_v31 = vld [vmem:[%s1358_s12 + $0xd0] sm:$0xf]  ;;  %v934_v33 = vor.u32 %v1032_v26, %v931_v27 }
  0x2c   : > { %v1049_v32 = vld [vmem:[%s1358_s12 + $0xd4] sm:$0xf0]  ;;  %613 = vmatpush.bf16.msra.mxu2 %v942_v17  ;;  %v998_v34 = vor.u32 %v1048_v28, %v995_v30  ;;  %v921_v35 = vld [vmem:[%s1358_s12 + $0x40] sm:$0xf]  ;;  %v1031_v36 = vld [vmem:[%s1358_s12 + $0x44] sm:$0xf0] }
  0x2d   : > { %642 = vmatpush.bf16.msra.mxu3 %v1006_v21  ;;  %v1030_v37 = vld [vmem:[%s1358_s12 + $0x44] sm:$0xf]  ;;  %584 = vmatpush.bf16.msra.mxu1 %v1002_v25  ;;  %v994_v38 = vor.u32 %v1049_v32, %v993_v31  ;;  %v923_v39 = vld [vmem:[%s1358_s12 + $0x48] sm:$0xf0]  ;;  %v985_v42 = vld [vmem:[%s1358_s12 + $0xc0] sm:$0xf]  ;;  %v922_v44 = vor.u32 %v1031_v36, %v921_v35 }
  0x2e   : > { %v1046_v40 = vld [vmem:[%s1358_s12 + $0xc4] sm:$0xf]  ;;  %v987_v41 = vld [vmem:[%s1358_s12 + $0xc8] sm:$0xf0]  ;;  %v1047_v43 = vld [vmem:[%s1358_s12 + $0xc4] sm:$0xf0]  ;;  %v926_v45 = vor.u32 %v1030_v37, %v923_v39 }
  0x2f   : > { %556 = vmatpush.bf16.msra.mxu0 %v930_v29  ;;  %v990_v46 = vor.u32 %v1046_v40, %v987_v41  ;;  %v913_v47 = vld [vmem:[%s1358_s12 + $0x30] sm:$0xf]  ;;  %v1029_v48 = vld [vmem:[%s1358_s12 + $0x34] sm:$0xf0]  ;;  %v1028_v49 = vld [vmem:[%s1358_s12 + $0x34] sm:$0xf]  ;;  %v986_v50 = vor.u32 %v1047_v43, %v985_v42 }
  0x30   : > { %614 = vmatpush.bf16.msra.mxu2 %v934_v33  ;;  %v915_v51 = vld [vmem:[%s1358_s12 + $0x38] sm:$0xf0]  ;;  %v1044_v52 = vld [vmem:[%s1358_s12 + $0xb4] sm:$0xf]  ;;  %v977_v54 = vld [vmem:[%s1358_s12 + $0xb0] sm:$0xf]  ;;  %v914_v56 = vor.u32 %v1029_v48, %v913_v47 }
  0x31   : > { %643 = vmatpush.bf16.msra.mxu3 %v998_v34  ;;  %585 = vmatpush.bf16.msra.mxu1 %v994_v38  ;;  %v979_v53 = vld [vmem:[%s1358_s12 + $0xb8] sm:$0xf0]  ;;  %v1045_v55 = vld [vmem:[%s1358_s12 + $0xb4] sm:$0xf0]  ;;  %v918_v57 = vor.u32 %v1028_v49, %v915_v51  ;;  %v905_v59 = vld [vmem:[%s1358_s12 + $0x20] sm:$0xf] }
  0x32   : > { %v982_v58 = vor.u32 %v1044_v52, %v979_v53  ;;  %v1027_v60 = vld [vmem:[%s1358_s12 + $0x24] sm:$0xf0]  ;;  %v1026_v61 = vld [vmem:[%s1358_s12 + $0x24] sm:$0xf]  ;;  %v978_v62 = vor.u32 %v1045_v55, %v977_v54  ;;  %v907_v63 = vld [vmem:[%s1358_s12 + $0x28] sm:$0xf0] }
  0x33   : > { %557 = vmatpush.bf16.msra.mxu0 %v922_v44  ;;  %v1042_v0 = vld [vmem:[%s1358_s12 + $0xa4] sm:$0xf]  ;;  %v971_v1 = vld [vmem:[%s1358_s12 + $0xa8] sm:$0xf0]  ;;  %v969_v2 = vld [vmem:[%s1358_s12 + $0xa0] sm:$0xf]  ;;  %v906_v4 = vor.u32 %v1027_v60, %v905_v59  ;;  %v910_v6 = vor.u32 %v1026_v61, %v907_v63 }
  0x34   : > { %615 = vmatpush.bf16.msra.mxu2 %v926_v45  ;;  %v1043_v3 = vld [vmem:[%s1358_s12 + $0xa4] sm:$0xf0]  ;;  %v897_v5 = vld [vmem:[%s1358_s12 + $0x10] sm:$0xf]  ;;  %v974_v7 = vor.u32 %v1042_v0, %v971_v1  ;;  %v1025_v8 = vld [vmem:[%s1358_s12 + $0x14] sm:$0xf0] }
  0x35   : > { %644 = vmatpush.bf16.msra.mxu3 %v990_v46  ;;  %586 = vmatpush.bf16.msra.mxu1 %v986_v50  ;;  %v1024_v9 = vld [vmem:[%s1358_s12 + $0x14] sm:$0xf]  ;;  %v899_v10 = vld [vmem:[%s1358_s12 + $0x18] sm:$0xf0]  ;;  %v970_v11 = vor.u32 %v1043_v3, %v969_v2  ;;  %v311_v14 = vld [vmem:[%s1563_s2 + $0x28] sm:$0xff]  ;;  %v1246_v17 = vmov 0   ;;  %v898_v18 = vor.u32 %v1025_v8, %v897_v5 }
  0x36   : > { %v1040_v12 = vld [vmem:[%s1358_s12 + $0x94] sm:$0xf]  ;;  %v963_v13 = vld [vmem:[%s1358_s12 + $0x98] sm:$0xf0]  ;;  %v961_v15 = vld [vmem:[%s1358_s12 + $0x90] sm:$0xf]  ;;  %1128 = vset.pattern.permute.xlu1 %v1246_v17  ;;  %1127 = vset.pattern.permute.xlu0 %v1246_v17  ;;  %v902_v20 = vor.u32 %v1024_v9, %v899_v10 }
  0x37   : > { %558 = vmatpush.bf16.msra.mxu0 %v914_v56  ;;  %v1041_v16 = vld [vmem:[%s1358_s12 + $0x94] sm:$0xf0]  ;;  %341 = vperm.xlu1 %1128, %v311_v14   ;;  %v966_v21 = vor.u32 %v1040_v12, %v963_v13  ;;  %v889_v22 = vld [vmem:[%s1358_s12] sm:$0xf]  ;;  %v1023_v23 = vld [vmem:[%s1358_s12 + $0x4] sm:$0xf0] }
  0x38   : > { %616 = vmatpush.bf16.msra.mxu2 %v918_v57  ;;  %v313_v19 = vld [vmem:[%s1563_s2 + $0x38] sm:$0xff]  ;;  %v1022_v24 = vld [vmem:[%s1358_s12 + $0x4] sm:$0xf]  ;;  %v962_v25 = vor.u32 %v1041_v16, %v961_v15  ;;  %v891_v26 = vld [vmem:[%s1358_s12 + $0x8] sm:$0xf0]  ;;  %1129 = vset.pattern.permute.xlu2 %v1246_v17  ;;  %v890_v31 = vor.u32 %v1023_v23, %v889_v22  ;;  %s687_s15 = sld [smem:[#allocation2]] }
  0x39   : > { %645 = vmatpush.bf16.msra.mxu3 %v982_v58  ;;  %587 = vmatpush.bf16.msra.mxu1 %v978_v62  ;;  %v1038_v27 = vld [vmem:[%s1358_s12 + $0x84] sm:$0xf]  ;;  %v955_v28 = vld [vmem:[%s1358_s12 + $0x88] sm:$0xf0]  ;;  %v953_v29 = vld [vmem:[%s1358_s12 + $0x80] sm:$0xf]  ;;  %v894_v34 = vor.u32 %v1022_v24, %v891_v26 }
  0x3a   : > { %351 = vperm.xlu0 %1127, %v313_v19   ;;  %v1039_v30 = vld [vmem:[%s1358_s12 + $0x84] sm:$0xf0]  ;;  %v857_v32 = vld [vmem:[%s1562_s1] sm:$0xf]  ;;  %v958_v35 = vor.u32 %v1038_v27, %v955_v28  ;;  %v1054_v36 = vld [vmem:[%s1562_s1 + $0x4] sm:$0xf] }
  0x3b   : > { %559 = vmatpush.bf16.msra.mxu0 %v906_v4  ;;  %v1055_v33 = vld [vmem:[%s1562_s1 + $0x4] sm:$0xf0]  ;;  %v859_v37 = vld [vmem:[%s1562_s1 + $0x8] sm:$0xf0]  ;;  %v310_v38 = vld [vmem:[%s1563_s2 + $0x20] sm:$0xff]  ;;  %v954_v39 = vor.u32 %v1039_v30, %v953_v29  ;;  %s854_s16 = sshll.u32 %s1354_s28, 1 }
  0x3c   : > { %617 = vmatpush.bf16.msra.mxu2 %v910_v6  ;;  %v858_v40 = vor.u32 %v1055_v33, %v857_v32  ;;  %v312_v41 = vld [vmem:[%s1563_s2 + $0x30] sm:$0xff]  ;;  %v862_v42 = vor.u32 %v1054_v36, %v859_v37  ;;  %v306_v43 = vld [vmem:[%s1563_s2] sm:$0xff]  ;;  %v307_v44 = vld [vmem:[%s1563_s2 + $0x8] sm:$0xff]  ;;  %s1018_s17 = sshll.u32 %s1234_s23, 1  ;;  %s263_s26 = scalar_lea.vmem [#allocation6], %s854_s16  ;;  %vm736_vm1 = vcmask 1040384  }
  0x3d   : > { %646 = vmatpush.bf16.msra.mxu3 %v974_v7  ;;  %588 = vmatpush.bf16.msra.mxu1 %v970_v11  ;;  %v865_v45 = vld [vmem:[%s1562_s1 + $0x10] sm:$0xf]  ;;  %v1057_v46 = vld [vmem:[%s1562_s1 + $0x14] sm:$0xf0]  ;;  %v1056_v47 = vld [vmem:[%s1562_s1 + $0x14] sm:$0xf]  ;;  %s757_s4 = scalar_lea.hbm %s1566_s5, %s1018_s17 }
  0x3e   : > { %v867_v48 = vld [vmem:[%s1562_s1 + $0x18] sm:$0xf0]  ;;  %v866_v49 = vor.u32 %v1057_v46, %v865_v45  ;;  %v308_v52 = vld [vmem:[%s1563_s2 + $0x10] sm:$0xff]  ;;  %v873_v53 = vld [vmem:[%s1562_s1 + $0x20] sm:$0xf]  ;;  %s759_s30 = sshll.u32 %s263_s26, 4  ;;  %s760_s30 = int_to_ptr.vmem [resolvable:$true] %s759_s30 }
  0x3f   : > { %560 = vmatpush.bf16.msra.mxu0 %v898_v18  ;;  %336 = vperm.xlu1 %1128, %v310_v38   ;;  %v870_v50 = vor.u32 %v1056_v47, %v867_v48  ;;  %v309_v51 = vld [vmem:[%s1563_s2 + $0x18] sm:$0xff]  ;;  %v1059_v54 = vld [vmem:[%s1562_s1 + $0x24] sm:$0xf0]  ;;  %v1058_v55 = vld [vmem:[%s1562_s1 + $0x24] sm:$0xf]  ;;  %s761_s11 = sshll.u32 %s757_s4, 4  ;;  %s762_s11 = int_to_ptr.hbm [resolvable:$true] %s761_s11 }
  0x40   : > { %618 = vmatpush.bf16.msra.mxu2 %v902_v20  ;;  %331 = vperm.xlu2 %1129, %v309_v51   ;;  %v875_v56 = vld [vmem:[%s1562_s1 + $0x28] sm:$0xf0]  ;;  %v874_v57 = vor.u32 %v1059_v54, %v873_v53  ;;  %v881_v59 = vld [vmem:[%s1562_s1 + $0x30] sm:$0xf]  ;;  %v1061_v60 = vld [vmem:[%s1562_s1 + $0x34] sm:$0xf0] }
  0x41   : > { %647 = vmatpush.bf16.msra.mxu3 %v966_v21  ;;  %589 = vmatpush.bf16.msra.mxu1 %v962_v25  ;;  %v878_v58 = vor.u32 %v1058_v55, %v875_v56  ;;  %v1060_v61 = vld [vmem:[%s1562_s1 + $0x34] sm:$0xf]  ;;  %v883_v62 = vld [vmem:[%s1562_s1 + $0x38] sm:$0xf0]  ;;  %v882_v63 = vor.u32 %v1061_v60, %v881_v59  ;;  %s745_s23 = scalar_lea.sflag [#allocation5], %s1354_s28  ;;  %s1174_s12 = sshra.s32 %s762_s11, 4  ;;  %s1175_s12 = int_to_ptr.hbm [resolvable:$true] %s1174_s12 }
  0x42   : > { %346 = vperm.xlu0 %1127, %v312_v41   ;;  %v886_v0 = vor.u32 %v1060_v61, %v883_v62  ;;  %s1176_s29 = scalar_lea.hbm %s1175_s12, 2  ;;  %s1180_s13 = scalar_lea.hbm %s1566_s5, 4 }
  0x43   : > { %561 = vmatpush.bf16.msra.mxu0 %v890_v31  ;;  %p1177_p4 = scmp.ne.s32.totalorder %s1175_s12, %s1176_s29  ;;  %p1181_p7 = scmp.lt.s32.totalorder %s1175_s12, %s1566_s5 }
  0x44   : > { %619 = vmatpush.bf16.msra.mxu2 %v894_v34  ;;  %p1182_p8 = scmp.lt.s32.totalorder %s1180_s13, %s1176_s29 }
  0x45   : > { %648 = vmatpush.bf16.msra.mxu3 %v958_v35  ;;  %590 = vmatpush.bf16.msra.mxu1 %v954_v39  ;;  %p1178_p5 = pnand %p1177_p4, %p1331_p9 }
  0x46   : > { %562 = vmatmul.bf16.vlgmr.msra.gmra.mxu0 %v858_v40  ;;  %p1183_p10 = por %p1182_p8, %p1181_p7 }
  0x47   : > { %620 = vmatmul.bf16.vlgmr.msra.gmra.mxu2 %v858_v40  ;;  %316 = vperm.xlu1 %1128, %v306_v43   ;;  %p1179_p6 = pneg %p1178_p5 }
  0x48   : > { %649 = vmatmul.bf16.vlgmr.msra.gmra.mxu3 %v862_v42  ;;  %591 = vmatmul.bf16.vlgmr.msra.gmra.mxu1 %v862_v42 }
  0x49   : > { %326 = vperm.xlu2 %1129, %v308_v52   ;;  %p1184_p13 = pnand %p1183_p10, %p1179_p6 }
  0x4a   : > { %321 = vperm.xlu0 %1127, %v307_v44  }
  0x56   : > { %567 = vmatmul.bf16.gmra.mxu0 %v866_v49 }
  0x57   : > { %625 = vmatmul.bf16.gmra.mxu2 %v866_v49 }
  0x58   : > { %654 = vmatmul.bf16.gmra.mxu3 %v870_v50  ;;  %596 = vmatmul.bf16.gmra.mxu1 %v870_v50 }
  0x66   : > { %572 = vmatmul.bf16.gmra.mxu0 %v874_v57 }
  0x67   : > { %630 = vmatmul.bf16.gmra.mxu2 %v874_v57 }
  0x68   : > { %659 = vmatmul.bf16.gmra.mxu3 %v878_v58  ;;  %601 = vmatmul.bf16.gmra.mxu1 %v878_v58 }
  0x76   : > { %577 = vmatmul.bf16.gmra.mxu0 %v882_v63 }
  0x77   : > { %635 = vmatmul.bf16.gmra.mxu2 %v882_v63 }
  0x78   : > { %664 = vmatmul.bf16.gmra.mxu3 %v886_v0  ;;  %606 = vmatmul.bf16.gmra.mxu1 %v886_v0 }
  0x9a   : > { %v332_v36 = vpop.permute.xlu2 %331 }
  0xa3   : > { %v327_v51 = vpop.permute.xlu2 %326 }
  0xa9   : > { %v342_v1 = vpop.permute.xlu1 %341 }
  0xac   : > { %v352_v29 = vpop.permute.xlu0 %351 }
  0xb1   : > { %v1500_v2 = vpop.permute.xlu1 %336 }
  0xb4   : > { %v347_v35 = vpop.permute.xlu0 %346 }
  0xb9   : > { %v317_v4 = vpop.permute.xlu1 %316 }
  0xbc   : > { %v322_v50 = vpop.permute.xlu0 %321 }
  0xc3   : > { %v563_v3 = vpop.f32.mrf.mxu0 }
  0xc4   : > { %v564_v5 = vadd.f32 %v563_v3, %v317_v4 }
  0xc5   : > { %v592_v6 = vpop.f32.mrf.mxu1 }
  0xc6   : > { %v1502_v7 = vadd.f32 %v592_v6, %v564_v5 }
  0xca   : > { %v621_v8 = vpop.f32.mrf.mxu2 }
  0xcb   : > { %v650_v9 = vpop.f32.mrf.mxu3  ;;  %v622_v10 = vadd.f32 %v621_v8, %v317_v4  ;;  %v565_v11 = vpop.f32.mrf.mxu0 }
  0xcc   : > { %v566_v59 = vadd.f32 %v565_v11, %v322_v50 }
  0xcd   : > { %v1504_v12 = vadd.f32 %v650_v9, %v622_v10  ;;  %v594_v13 = vpop.f32.mrf.mxu1 }
  0xce   : > { %v595_v10 = vadd.f32 %v594_v13, %v566_v59  ;;  %v670_v13 = vmax.f32 %v1502_v7, 0.0  ;;  %v688_v7 = vstv %s687_s15 }
  0xd2   : > { %v1506_v14 = vpop.f32.mrf.mxu2 }
  0xd3   : > { %v1508_v15 = vpop.f32.mrf.mxu3  ;;  %v568_v16 = vpop.f32.mrf.mxu0 }
  0xd4   : > { %v569_v53 = vadd.f32 %v568_v16, %v327_v51 }
  0xd5   : > { %v597_v17 = vpop.f32.mrf.mxu1 }
  0xd6   : > { %v598_v5 = vadd.f32 %v597_v17, %v569_v53 }
  0xda   : > { %v626_v18 = vpop.f32.mrf.mxu2 }
  0xdb   : > { %v1510_v19 = vpop.f32.mrf.mxu3  ;;  %v570_v20 = vpop.f32.mrf.mxu0 }
  0xdc   : > { %v571_v47 = vadd.f32 %v570_v20, %v332_v36 }
  0xdd   : > { %v599_v21 = vpop.f32.mrf.mxu1 }
  0xde   : > { %v600_v60 = vadd.f32 %v599_v21, %v571_v47  ;;  %v674_v21 = vmax.f32 %v598_v5, 0.0 }
  0xe0   : > { %v676_v16 = vmax.f32 %v600_v60, 0.0 }
  0xe2   : > { %v628_v22 = vpop.f32.mrf.mxu2 }
  0xe3   : > { %v657_v23 = vpop.f32.mrf.mxu3  ;;  %v573_v24 = vpop.f32.mrf.mxu0  ;;  %v629_v6 = vadd.f32 %v628_v22, %v332_v36 }
  0xe4   : > { %v574_v44 = vadd.f32 %v573_v24, %v1500_v2  ;;  %v624_v24 = vadd.f32 %v1506_v14, %v322_v50  ;;  %v686_v14 = vld [vmem:[%s1564_s3] sm:$0x1] }
  0xe5   : > { %v602_v25 = vpop.f32.mrf.mxu1 }
  0xe6   : > { %v603_v54 = vadd.f32 %v602_v25, %v574_v44 }
  0xe8   : > { %v678_v4 = vmax.f32 %v603_v54, 0.0 }
  0xea   : > { %v631_v26 = vpop.f32.mrf.mxu2 }
  0xeb   : > { %v660_v27 = vpop.f32.mrf.mxu3  ;;  %v575_v28 = vpop.f32.mrf.mxu0  ;;  %v632_v63 = vadd.f32 %v631_v26, %v1500_v2  ;;  %v658_v2 = vadd.f32 %v657_v23, %v629_v6  ;;  %v672_v26 = vmax.f32 %v595_v10, 0.0 }
  0xec   : > { %v576_v41 = vadd.f32 %v575_v28, %v342_v1  ;;  %v671_v28 = vmax.f32 %v1504_v12, 0.0 }
  0xed   : > { %v604_v30 = vpop.f32.mrf.mxu1  ;;  %v661_v20 = vadd.f32 %v660_v27, %v632_v63  ;;  %v677_v27 = vmax.f32 %v658_v2, 0.0 }
  0xee   : > { %v605_v48 = vadd.f32 %v604_v30, %v576_v41 }
  0xef   : > { %v679_v22 = vmax.f32 %v661_v20, 0.0 }
  0xf0   : > { %v680_v61 = vmax.f32 %v605_v48, 0.0 }
  0xf2   : > { %v633_v31 = vpop.f32.mrf.mxu2 }
  0xf3   : > { %v662_v32 = vpop.f32.mrf.mxu3  ;;  %v578_v33 = vpop.f32.mrf.mxu0  ;;  %v634_v57 = vadd.f32 %v633_v31, %v342_v1  ;;  %v627_v1 = vadd.f32 %v626_v18, %v327_v51  ;;  %v653_v18 = vadd.f32 %v1508_v15, %v624_v24 }
  0xf4   : > { %v579_v37 = vadd.f32 %v578_v33, %v347_v35 }
  0xf5   : > { %v607_v34 = vpop.f32.mrf.mxu1  ;;  %v663_v8 = vadd.f32 %v662_v32, %v634_v57  ;;  %v656_v17 = vadd.f32 %v1510_v19, %v627_v1  ;;  %v673_v19 = vmax.f32 %v653_v18, 0.0 }
  0xf6   : > { %v608_v45 = vadd.f32 %v607_v34, %v579_v37 }
  0xf7   : > { %v681_v25 = vmax.f32 %v663_v8, 0.0  ;;  %v675_v23 = vmax.f32 %v656_v17, 0.0 }
  0xf8   : > { %v682_v55 = vmax.f32 %v608_v45, 0.0 }
  0xfa   : > { %v636_v38 = vpop.f32.mrf.mxu2 }
  0xfb   : > { %v665_v39 = vpop.f32.mrf.mxu3  ;;  %v580_v40 = vpop.f32.mrf.mxu0  ;;  %v637_v52 = vadd.f32 %v636_v38, %v347_v35 }
  0xfc   : > { %v581_v42 = vadd.f32 %v580_v40, %v352_v29 }
  0xfd   : > { %v609_v43 = vpop.f32.mrf.mxu1  ;;  %v666_v0 = vadd.f32 %v665_v39, %v637_v52 }
  0xfe   : > { %v610_v46 = vadd.f32 %v609_v43, %v581_v42 }
  0xff   : > { %v683_v11 = vmax.f32 %v666_v0, 0.0 }
 0x100   : > { %v684_v49 = vmax.f32 %v610_v46, 0.0 }
 0x102   : > { %v638_v56 = vpop.f32.mrf.mxu2  ;;  %701 = vmatpush.msrb.mxu0 %v684_v49 }
 0x103   : > { %v639_v58 = vadd.f32 %v638_v56, %v352_v29  ;;  %v667_v62 = vpop.f32.mrf.mxu3  ;;  %v739_v29 = vlaneseq }
 0x104   : > { %702 = vmatpush.msrb.mxu0 %v682_v55 }
 0x105   : > { %v668_v3 = vadd.f32 %v667_v62, %v639_v58  ;;  %vm741_vm2 = vcmp.lt.s32.totalorder %v739_v29, 256 }
 0x106   : > { %703 = vmatpush.msrb.mxu0 %v680_v61 }
 0x107   : > { %v685_v9 = vmax.f32 %v668_v3, 0.0 }
 0x108   : > { %704 = vmatpush.msrb.mxu0 %v678_v4 }
 0x109   : > { %721 = vmatpush.msrb.mxu1 %v685_v9 }
 0x10a   : > { %705 = vmatpush.msrb.mxu0 %v676_v16 }
 0x10b   : > { %722 = vmatpush.msrb.mxu1 %v683_v11 }
 0x10c   : > { %706 = vmatpush.msrb.mxu0 %v674_v21 }
 0x10d   : > { %723 = vmatpush.msrb.mxu1 %v681_v25 }
 0x10e   : > { %707 = vmatpush.msrb.mxu0 %v672_v26 }
 0x10f   : > { %724 = vmatpush.msrb.mxu1 %v679_v22 }
 0x110   : > { %708 = vmatpush.msrb.mxu0 %v670_v13 }
 0x111   : > { %725 = vmatpush.msrb.mxu1 %v677_v27  ;;  %1015 = vmatmul.msk.f32.vlgmr.msrb.gmra.mxu0 %vm689_vm0, %v686_v14 }
 0x113   : > { %726 = vmatpush.msrb.mxu1 %v675_v23 }
 0x115   : > { %727 = vmatpush.msrb.mxu1 %v673_v19 }
 0x117   : > { %728 = vmatpush.msrb.mxu1 %v671_v28 }
 0x118   : > { %1016 = vmatmul.msk.f32.vlgmr.msrb.gmra.mxu1 %vm689_vm0, %v686_v14 }
 0x18e   : > { %v710_v15 = vpop.f32.mrf.mxu0 }
 0x18f   : > { %v711_v32 = vadd.f32 %v710_v15, %v688_v7 }
 0x195   : > { %v730_v30 = vpop.f32.mrf.mxu1 }
 0x196   : > { %v731_v31 = vadd.f32 %v730_v30, %v688_v7 }
 0x198   : > { %v735_v12 = vrot.slane %v731_v31, 7 }
 0x19a   : > { %v737_v33 = vsel %vm736_vm1, %v711_v32, %v735_v12 }
 0x19b   : > { %743 = vst.msk [vmem:[%s263_s26] sm:$0x3] %vm741_vm2, %v737_v33 }
 0x19c   : > { %1187 = shalt.err (!%p1184_p13)
}
 0x19d   : > { %1064 = dma.vmem_to_hbm [thread:$0]  (%p1331_p9), %s760_s30, 32, %s762_s11, %s745_s23  }
 0x19e PF: > { %s773_s28 = sand.u32 1, %s1222_s20   ;;  %p1071_p0 = pnand %p848_p12, %p1338_p11 }
 0x19f   : > { %s774_s16 = scalar_lea.sflag [#allocation5], %s773_s28 }
 0x1a0   : > { %p1072_p1 = pneg %p1071_p0 }
 0x1a2   : > { %1217 = dma.done.wait (%p1072_p1), %s774_s16, 32  }
 0x1a3   : > { %1219 = vsyncadd (%p1072_p1), %s774_s16, 4294967264  ;;  %s22_s25 = sadd.s32 1, %s1242_s25   ;;  %s1571_s20 = smov %s1226_s21 }
 0x1a4   : > { %p19_p2 = scmp.ge.s32.totalorder %s22_s25, 4   ;;  %s1572_s21 = smov %s1230_s22 }
 0x1a5   : > { %s1573_s22 = smov %s1336_s8  ;;  %s1574_s23 = smov %s1238_s24 }
 0x1a6   : > { %s1575_s24 = smov %s1577_s27  ;;  %21 = sbr.rel (!%p19_p2) target bundleno = 8 (0x8), region = 85 }
 0x1ab   :  { %780 = vsyncpa [#allocation4], 1 }
 0x1ac   :  { %782 = vsyncpa [#allocation4 + $0x1], 1 }
 0x1ad   :  { %783 = vsyncpa [#allocation5], 1 }
 0x1ae   :  { %785 = vsyncpa [#allocation5 + $0x1], 1 }

</bundles_post_ra>
